<compile_context>
chip_gen: v7x
topology: tpu7x:2x2x1
jax: 0.10.0
libtpu: 0.0.40
codegen_flags: <defaults>
</compile_context>

<pallas_src>
import jax
import jax.numpy as jnp
from jax.experimental import pallas as pl
from jax.experimental.pallas import tpu as pltpu


SUBLANE = 8     # f32 sublane granularity — batch tiles kept sublane-aligned.


def _round_up(x, m):
    return ((x + m - 1) // m) * m


def _dqn_mlp_kernel(x_ref,
                    w1_ref, b1_ref,
                    w2_ref, b2_ref,
                    w3_ref, b3_ref,
                    w4_ref, b4_ref,
                    o_ref):
    """Fused 4-layer MLP on one batch tile (weights VMEM-resident across tiles).

    bf16 MXU operands (x, weights, inter-layer activations); bias-add, ReLU and
    accumulation in f32.  Dropout(0.1) -> identity (eval mode).
    """
    h = x_ref[...]                                                  # bf16 [tb, S]

    h = jnp.dot(h, w1_ref[...], preferred_element_type=jnp.float32) + b1_ref[...]
    h = jnp.maximum(h, 0.0).astype(jnp.bfloat16)
    # Dropout(0.1) -> identity in eval mode.

    h = jnp.dot(h, w2_ref[...], preferred_element_type=jnp.float32) + b2_ref[...]
    h = jnp.maximum(h, 0.0).astype(jnp.bfloat16)
    # Dropout(0.1) -> identity in eval mode.

    h = jnp.dot(h, w3_ref[...], preferred_element_type=jnp.float32) + b3_ref[...]
    h = jnp.maximum(h, 0.0).astype(jnp.bfloat16)

    out = jnp.dot(h, w4_ref[...], preferred_element_type=jnp.float32) + b4_ref[...]
    o_ref[...] = out.astype(o_ref.dtype)


def _pick_batch_tile(B, tile_b):
    """Batch tile: single tile for tiny B, >=2 tiles for mid-size B (v7x megacore),
    roofline-sized tiles (default 1024) for large B."""
    if B <= SUBLANE:
        return B                       # block second-last dim == full batch dim (legal)
    b8 = _round_up(B, SUBLANE)
    if b8 <= 2 * tile_b:
        return min(tile_b, _round_up(pl.cdiv(b8, 2), SUBLANE))
    return tile_b


def improved_dqn_forward(x, params, *, tile_b=1024):
    """x: [B, state_dim] float (any float dtype).  params from init_params."""
    B, state_dim = x.shape
    action_dim = params["action_dim"]
    assert params["w1"].shape[0] == state_dim

    d1 = params["w1"].shape[1]
    d2 = params["w2"].shape[1]
    d3 = params["w3"].shape[1]
    do = params["w4"].shape[1]
    assert do == action_dim

    # bf16 input stream (kernel truncates to bf16 before the first dot anyway;
    # under jit this cast fuses with the producer of x).
    x_bf16 = x.astype(jnp.bfloat16)

    tb = _pick_batch_tile(B, tile_b)
    grid = (pl.cdiv(B, tb),)

    flops = 2 * B * (state_dim * d1 + d1 * d2 + d2 * d3 + d3 * do)
    bytes_accessed = int(
        B * state_dim * 2 + B * do * 4                               # bf16 in, f32 out
        + sum(int(params[f"w{i}"].size) * 2 for i in range(1, 5))    # bf16 weights
        + sum(int(params[f"b{i}"].size) * 4 for i in range(1, 5)))   # f32 biases

    def resident(arr):
        # Same block for every grid step -> DMA'd once, stays VMEM-resident.
        return pl.BlockSpec(arr.shape, lambda i: (0, 0))

    out = pl.pallas_call(
        _dqn_mlp_kernel,
        out_shape=jax.ShapeDtypeStruct((B, action_dim), jnp.float32),
        grid=grid,
        in_specs=[
            pl.BlockSpec((tb, state_dim), lambda i: (i, 0)),         # x: batch-tiled
            resident(params["w1"]), resident(params["b1"]),
            resident(params["w2"]), resident(params["b2"]),
            resident(params["w3"]), resident(params["b3"]),
            resident(params["w4"]), resident(params["b4"]),
        ],
        out_specs=pl.BlockSpec((tb, action_dim), lambda i: (i, 0)),  # logical width
        compiler_params=pltpu.CompilerParams(
            dimension_semantics=("parallel",)),                      # v7x: shard tiles over 2 TCs
        cost_estimate=pl.CostEstimate(
            flops=flops, transcendentals=0, bytes_accessed=bytes_accessed),
    )(x_bf16,
      params["w1"], params["b1"],
      params["w2"], params["b2"],
      params["w3"], params["b3"],
      params["w4"], params["b4"])

    return out


def init_params(key, state_dim, action_dim):
    """PyTorch-Linear-like uniform init.

    PyTorch Linear stores weight as (out, in); we store the transpose (in, out)
    at natural (unpadded) shapes.  Weights -> bf16 (MXU operands, half HBM
    traffic); biases stay f32, shaped [1, out] for clean lane broadcasting.
    """
    dims = [(state_dim, 256), (256, 128), (128, 64), (64, action_dim)]
    params = {"state_dim": state_dim, "action_dim": action_dim}
    for i, (fan_in, fan_out) in enumerate(dims, start=1):
        key, kw, kb = jax.random.split(key, 3)
        bound = 1.0 / jnp.sqrt(float(fan_in))
        w = jax.random.uniform(kw, (fan_in, fan_out), jnp.float32,
                               minval=-bound, maxval=bound)
        b = jax.random.uniform(kb, (fan_out,), jnp.float32,
                               minval=-bound, maxval=bound)
        params[f"w{i}"] = w.astype(jnp.bfloat16)
        params[f"b{i}"] = b.reshape(1, fan_out)
    return params


def reference_forward(x, params):
    """Pure-JAX f32 reference using the same (bf16-stored) parameters."""
    h = x.astype(jnp.float32)
    for i in (1, 2, 3):
        h = jnp.maximum(
            h @ params[f"w{i}"].astype(jnp.float32) + params[f"b{i}"], 0.0)
    return h @ params["w4"].astype(jnp.float32) + params["b4"]


if __name__ == "__main__":
    B, STATE_DIM, ACTION_DIM = 2, 32, 8

    key = jax.random.PRNGKey(0)
    key, kx = jax.random.split(key)
    x = jax.random.normal(kx, (B, STATE_DIM), dtype=jnp.float32)
    params = init_params(key, STATE_DIM, ACTION_DIM)

    out = improved_dqn_forward(x, params)
    out = jax.block_until_ready(out)

    ref = reference_forward(x, params)
    assert out.shape == (B, ACTION_DIM), out.shape
    # bf16 MXU operands (x, weights, activations) -> loose tolerance vs f32 reference.
    assert jnp.allclose(out, ref, atol=5e-2, rtol=5e-2), "mismatch vs reference"

    print("KERNEL_OK")
</pallas_src>

<mosaic_0001>
module attributes {stable_mosaic.version = 11 : i64} {
  func.func @_dqn_mlp_kernel(%arg0: i32, %arg1: memref<2x32xbf16, #tpu.memory_space<vmem>>, %arg2: memref<32x256xbf16, #tpu.memory_space<vmem>>, %arg3: memref<1x256xf32, #tpu.memory_space<vmem>>, %arg4: memref<256x128xbf16, #tpu.memory_space<vmem>>, %arg5: memref<1x128xf32, #tpu.memory_space<vmem>>, %arg6: memref<128x64xbf16, #tpu.memory_space<vmem>>, %arg7: memref<1x64xf32, #tpu.memory_space<vmem>>, %arg8: memref<64x8xbf16, #tpu.memory_space<vmem>>, %arg9: memref<1x8xf32, #tpu.memory_space<vmem>>, %arg10: memref<2x8xf32, #tpu.memory_space<vmem>>) attributes {dimension_semantics = [#tpu.dimension_semantics<parallel>], iteration_bounds = array<i64: 1>, scalar_prefetch = 0 : i64, scratch_operands = 0 : i64, tpu.core_type = #tpu.core_type<tc>, window_params = [{transform_indices = @transform_0, window_bounds = array<i64: 2, 32>}, {pipeline_mode = #tpu.pipeline_mode<synchronous>, transform_indices = @transform_1, window_bounds = array<i64: 32, 256>}, {pipeline_mode = #tpu.pipeline_mode<synchronous>, transform_indices = @transform_2, window_bounds = array<i64: 1, 256>}, {pipeline_mode = #tpu.pipeline_mode<synchronous>, transform_indices = @transform_3, window_bounds = array<i64: 256, 128>}, {pipeline_mode = #tpu.pipeline_mode<synchronous>, transform_indices = @transform_4, window_bounds = array<i64: 1, 128>}, {pipeline_mode = #tpu.pipeline_mode<synchronous>, transform_indices = @transform_5, window_bounds = array<i64: 128, 64>}, {pipeline_mode = #tpu.pipeline_mode<synchronous>, transform_indices = @transform_6, window_bounds = array<i64: 1, 64>}, {pipeline_mode = #tpu.pipeline_mode<synchronous>, transform_indices = @transform_7, window_bounds = array<i64: 64, 8>}, {pipeline_mode = #tpu.pipeline_mode<synchronous>, transform_indices = @transform_8, window_bounds = array<i64: 1, 8>}, {transform_indices = @transform_9, window_bounds = array<i64: 2, 8>}]} {
    %c0 = arith.constant 0 : index
    %c0_0 = arith.constant 0 : index
    %0 = vector.load %arg1[%c0, %c0_0] : memref<2x32xbf16, #tpu.memory_space<vmem>>, vector<2x32xbf16>
    %c0_1 = arith.constant 0 : index
    %c0_2 = arith.constant 0 : index
    %1 = vector.load %arg2[%c0_1, %c0_2] : memref<32x256xbf16, #tpu.memory_space<vmem>>, vector<32x256xbf16>
    %cst = arith.constant dense<0.000000e+00> : vector<2x256xf32>
    %2 = tpu.matmul %0, %1, %cst {dimension_numbers = #tpu.dot_dimension_numbers<[1], [0], [0], [1], [0, 0, 1, 1], [], []>} : vector<2x32xbf16>, vector<32x256xbf16>, vector<2x256xf32> -> vector<2x256xf32>
    %c0_3 = arith.constant 0 : index
    %c0_4 = arith.constant 0 : index
    %3 = vector.load %arg3[%c0_3, %c0_4] : memref<1x256xf32, #tpu.memory_space<vmem>>, vector<1x256xf32>
    %4 = vector.broadcast %3 : vector<1x256xf32> to vector<2x256xf32>
    %5 = arith.addf %2, %4 : vector<2x256xf32>
    %cst_5 = arith.constant 0.000000e+00 : f32
    %6 = vector.broadcast %cst_5 : f32 to vector<2x256xf32>
    %7 = arith.maximumf %5, %6 : vector<2x256xf32>
    %8 = arith.truncf %7 : vector<2x256xf32> to vector<2x256xbf16>
    %c0_6 = arith.constant 0 : index
    %c0_7 = arith.constant 0 : index
    %9 = vector.load %arg4[%c0_6, %c0_7] : memref<256x128xbf16, #tpu.memory_space<vmem>>, vector<256x128xbf16>
    %cst_8 = arith.constant dense<0.000000e+00> : vector<2x128xf32>
    %10 = tpu.matmul %8, %9, %cst_8 {dimension_numbers = #tpu.dot_dimension_numbers<[1], [0], [0], [1], [0, 0, 1, 1], [], []>} : vector<2x256xbf16>, vector<256x128xbf16>, vector<2x128xf32> -> vector<2x128xf32>
    %c0_9 = arith.constant 0 : index
    %c0_10 = arith.constant 0 : index
    %11 = vector.load %arg5[%c0_9, %c0_10] : memref<1x128xf32, #tpu.memory_space<vmem>>, vector<1x128xf32>
    %12 = vector.broadcast %11 : vector<1x128xf32> to vector<2x128xf32>
    %13 = arith.addf %10, %12 : vector<2x128xf32>
    %cst_11 = arith.constant 0.000000e+00 : f32
    %14 = vector.broadcast %cst_11 : f32 to vector<2x128xf32>
    %15 = arith.maximumf %13, %14 : vector<2x128xf32>
    %16 = arith.truncf %15 : vector<2x128xf32> to vector<2x128xbf16>
    %c0_12 = arith.constant 0 : index
    %c0_13 = arith.constant 0 : index
    %17 = vector.load %arg6[%c0_12, %c0_13] : memref<128x64xbf16, #tpu.memory_space<vmem>>, vector<128x64xbf16>
    %cst_14 = arith.constant dense<0.000000e+00> : vector<2x64xf32>
    %18 = tpu.matmul %16, %17, %cst_14 {dimension_numbers = #tpu.dot_dimension_numbers<[1], [0], [0], [1], [0, 0, 1, 1], [], []>} : vector<2x128xbf16>, vector<128x64xbf16>, vector<2x64xf32> -> vector<2x64xf32>
    %c0_15 = arith.constant 0 : index
    %c0_16 = arith.constant 0 : index
    %19 = vector.load %arg7[%c0_15, %c0_16] : memref<1x64xf32, #tpu.memory_space<vmem>>, vector<1x64xf32>
    %20 = vector.broadcast %19 : vector<1x64xf32> to vector<2x64xf32>
    %21 = arith.addf %18, %20 : vector<2x64xf32>
    %cst_17 = arith.constant 0.000000e+00 : f32
    %22 = vector.broadcast %cst_17 : f32 to vector<2x64xf32>
    %23 = arith.maximumf %21, %22 : vector<2x64xf32>
    %24 = arith.truncf %23 : vector<2x64xf32> to vector<2x64xbf16>
    %c0_18 = arith.constant 0 : index
    %c0_19 = arith.constant 0 : index
    %25 = vector.load %arg8[%c0_18, %c0_19] : memref<64x8xbf16, #tpu.memory_space<vmem>>, vector<64x8xbf16>
    %cst_20 = arith.constant dense<0.000000e+00> : vector<2x8xf32>
    %26 = tpu.matmul %24, %25, %cst_20 {dimension_numbers = #tpu.dot_dimension_numbers<[1], [0], [0], [1], [0, 0, 1, 1], [], []>} : vector<2x64xbf16>, vector<64x8xbf16>, vector<2x8xf32> -> vector<2x8xf32>
    %c0_21 = arith.constant 0 : index
    %c0_22 = arith.constant 0 : index
    %27 = vector.load %arg9[%c0_21, %c0_22] : memref<1x8xf32, #tpu.memory_space<vmem>>, vector<1x8xf32>
    %28 = vector.broadcast %27 : vector<1x8xf32> to vector<2x8xf32>
    %29 = arith.addf %26, %28 : vector<2x8xf32>
    %c0_23 = arith.constant 0 : index
    %c0_24 = arith.constant 0 : index
    %30 = vector.load %arg10[%c0_23, %c0_24] : memref<2x8xf32, #tpu.memory_space<vmem>>, vector<2x8xf32>
    tpu.vector_store %arg10[%c0_23, %c0_24], %29 {strides = array<i32>} : memref<2x8xf32, #tpu.memory_space<vmem>>, vector<2x8xf32>,
    return
  }
  func.func @transform_0(%arg0: i32) -> (i32, i32) {
    %c0_i32 = arith.constant 0 : i32
    %c0_i32_0 = arith.constant 0 : i32
    return %arg0, %c0_i32 : i32, i32
  }
  func.func @transform_1(%arg0: i32) -> (i32, i32) {
    %c0_i32 = arith.constant 0 : i32
    %c0_i32_0 = arith.constant 0 : i32
    %c0_i32_1 = arith.constant 0 : i32
    return %c0_i32, %c0_i32_0 : i32, i32
  }
  func.func @transform_2(%arg0: i32) -> (i32, i32) {
    %c0_i32 = arith.constant 0 : i32
    %c0_i32_0 = arith.constant 0 : i32
    %c0_i32_1 = arith.constant 0 : i32
    return %c0_i32, %c0_i32_0 : i32, i32
  }
  func.func @transform_3(%arg0: i32) -> (i32, i32) {
    %c0_i32 = arith.constant 0 : i32
    %c0_i32_0 = arith.constant 0 : i32
    %c0_i32_1 = arith.constant 0 : i32
    return %c0_i32, %c0_i32_0 : i32, i32
  }
  func.func @transform_4(%arg0: i32) -> (i32, i32) {
    %c0_i32 = arith.constant 0 : i32
    %c0_i32_0 = arith.constant 0 : i32
    %c0_i32_1 = arith.constant 0 : i32
    return %c0_i32, %c0_i32_0 : i32, i32
  }
  func.func @transform_5(%arg0: i32) -> (i32, i32) {
    %c0_i32 = arith.constant 0 : i32
    %c0_i32_0 = arith.constant 0 : i32
    %c0_i32_1 = arith.constant 0 : i32
    return %c0_i32, %c0_i32_0 : i32, i32
  }
  func.func @transform_6(%arg0: i32) -> (i32, i32) {
    %c0_i32 = arith.constant 0 : i32
    %c0_i32_0 = arith.constant 0 : i32
    %c0_i32_1 = arith.constant 0 : i32
    return %c0_i32, %c0_i32_0 : i32, i32
  }
  func.func @transform_7(%arg0: i32) -> (i32, i32) {
    %c0_i32 = arith.constant 0 : i32
    %c0_i32_0 = arith.constant 0 : i32
    %c0_i32_1 = arith.constant 0 : i32
    return %c0_i32, %c0_i32_0 : i32, i32
  }
  func.func @transform_8(%arg0: i32) -> (i32, i32) {
    %c0_i32 = arith.constant 0 : i32
    %c0_i32_0 = arith.constant 0 : i32
    %c0_i32_1 = arith.constant 0 : i32
    return %c0_i32, %c0_i32_0 : i32, i32
  }
  func.func @transform_9(%arg0: i32) -> (i32, i32) {
    %c0_i32 = arith.constant 0 : i32
    %c0_i32_0 = arith.constant 0 : i32
    return %arg0, %c0_i32 : i32, i32
  }
}

</mosaic_0001>

<bundles_post_ra>
// kernel: tpu_custom_call.1
= control target key start
LH: loop header
LB: loop body
LE: loop exit
PB: predicated region body
PF: predicated region fallthrough
CT: control target
= control target key end

     0   :  { %14 = vsyncpa [#allocation3], 0  ;;  %s912_s0 = inlined_call_operand.vmem [shape: bf16[2,32], index: 0, kind: input, shape index: {}]   ;;  %s913_s1 = inlined_call_operand.hbm [shape: bf16[32,256], index: 1, kind: input, shape index: {}]   ;;  %s914_s2 = inlined_call_operand.vmem [shape: f32[1,256], index: 2, kind: input, shape index: {}]   ;;  %s915_s3 = inlined_call_operand.vmem [shape: bf16[256,128], index: 3, kind: input, shape index: {}]   ;;  %s916_s4 = inlined_call_operand.vmem [shape: f32[1,128], index: 4, kind: input, shape index: {}]   ;;  %s917_s5 = inlined_call_operand.vmem [shape: bf16[128,64], index: 5, kind: input, shape index: {}]   ;;  %s918_s6 = inlined_call_operand.vmem [shape: f32[1,64], index: 6, kind: input, shape index: {}]   ;;  %s919_s7 = inlined_call_operand.vmem [shape: bf16[64,8], index: 7, kind: input, shape index: {}]   ;;  %s920_s8 = inlined_call_operand.vmem [shape: f32[1,8], index: 8, kind: input, shape index: {}]   ;;  %s921_s9 = inlined_call_operand.hbm [shape: f32[2,8], index: 9, kind: output, shape index: {}]  }
   0x1   :  { %15 = vsyncpa [#allocation4], 0  ;;  %s718_s30 = smov [#allocation2]   ;;  %s670_s13 = scalar_lea.hbm %s913_s1, 512 }
   0x2   :  { %s23_s10 = sshll.u32 %s718_s30, 4  ;;  %p671_p0 = scmp.ne.s32.totalorder %s913_s1, %s670_s13  ;;  %s24_s10 = int_to_ptr.vmem [resolvable:$true] %s23_s10 }
   0x3   :  { %p674_p1 = scmp.lt.u32.totalorder %s670_s13, %s913_s1 }
   0x5   :  { %p676_p2 = pnand %p674_p1, %p671_p0 }
   0x7   :  { %679 = shalt.err (!%p676_p2)
}
   0x8   :  { %s680_s18 = scalar_lea.vmem %s24_s10, 512  ;;  %p685_p4 = scmp.lt.s32.totalorder %s24_s10, %s24_s10 }
   0x9   :  { %p681_p3 = scmp.ne.s32.totalorder %s24_s10, %s680_s18  ;;  %p686_p5 = scmp.lt.s32.totalorder %s680_s18, %s680_s18 }
   0xb   :  { %p687_p6 = por %p686_p5, %p685_p4 }
   0xd   :  { %p688_p7 = pnand %p687_p6, %p681_p3 }
   0xf   :  { %691 = shalt.err (!%p688_p7)
}
  0x10   :  { %s719_s19 = smov 128   ;;  %s720_s20 = smov 8  }
  0x11   :  { %29 = dma.hbm_to_vmem [thread:$0]  %s913_s1, 512, %s24_s10, [#allocation3], %s719_s19, %s719_s19, %s720_s20  }
  0x12   :  { %714 = dma.done.wait [#allocation3], 512  }
  0x13   :  { %715 = vsyncadd [#allocation3], 4294966784  ;;  %v721_v0 = vmov 0   ;;  %v636_v1 = vld [vmem:[#allocation2 + $0x4] ss:$8 sps:$4 sm:$0xff]   ;;  %vm85_vm0 = vcmask 261120   ;;  %v55_v29 = vlaneseq }
  0x14   :  { %121 = vmatprep.mubr.bf16.mxu0 %v721_v0  ;;  %v638_v2 = vld [vmem:[#allocation2] ss:$8 sps:$4 sm:$0xff]   ;;  %89 = vmatprep.subr.bf16.mxu0 %v636_v1  ;;  %v639_v3 = vld [vmem:[#allocation2 + $0x14] ss:$8 sps:$4 sm:$0xff]   ;;  %v641_v4 = vld [vmem:[#allocation2 + $0x10] ss:$8 sps:$4 sm:$0xff]  }
  0x15   :  { %90 = vmatpush1.bf16.msra.mxu0 %v638_v2  ;;  %v642_v5 = vld [vmem:[%s915_s3 + $0x40] sm:$0xff]   ;;  %v644_v8 = vld [vmem:[%s915_s3 + $0x48] sm:$0xff]   ;;  %v646_v10 = vld [vmem:[%s915_s3 + $0x50] sm:$0xff]   ;;  %v722_v23 = vmov 0.0   ;;  %v56_v30 = vshrl.u32 %v55_v29, 7  ;;  %vm723_vm1 = vmmov 0  }
  0x16   :  { %91 = vmatprep.subr.bf16.mxu0 %v639_v3  ;;  %v643_v6 = vld [vmem:[%s915_s3] sm:$0xff]   ;;  %561 = vmatprep.subr.bf16.mxu1 %v642_v5  ;;  %v645_v9 = vld [vmem:[%s915_s3 + $0x8] sm:$0xff]   ;;  %v647_v11 = vld [vmem:[%s915_s3 + $0x10] sm:$0xff]   ;;  %vm463_vm2 = vcmask 523264   ;;  %s724_s15 = smov [#allocation5]   ;;  %vm507_vm3 = vcmask 58368  }
  0x17   :  { %v48_v7 = vld [vmem:[%s912_s0] sm:$0x1]  ;;  %562 = vmatpush3.bf16.msra.mxu1 %v643_v6  ;;  %v648_v12 = vld [vmem:[%s915_s3 + $0x58] sm:$0xff]   ;;  %v652_v16 = vld [vmem:[%s915_s3 + $0x68] sm:$0xff]   ;;  %v57_v31 = vsub.s32 0, %v56_v30  ;;  %v61_v33 = vsub.s32 1, %v56_v30 }
  0x18   :  { %563 = vmatprep.subr.bf16.mxu1 %v644_v8  ;;  %v649_v13 = vld [vmem:[%s915_s3 + $0x18] sm:$0xff]   ;;  %v650_v14 = vld [vmem:[%s915_s3 + $0x60] sm:$0xff]   ;;  %v653_v17 = vld [vmem:[%s915_s3 + $0x28] sm:$0xff]  }
  0x19   :  { %92 = vmatpush1.bf16.msra.mxu0 %v641_v4  ;;  %v651_v15 = vld [vmem:[%s915_s3 + $0x20] sm:$0xff]   ;;  %v654_v18 = vld [vmem:[%s915_s3 + $0x70] sm:$0xff]   ;;  %v656_v20 = vld [vmem:[%s915_s3 + $0x78] sm:$0xff]  }
  0x1a   :  { %v655_v19 = vld [vmem:[%s915_s3 + $0x30] sm:$0xff]   ;;  %v657_v21 = vld [vmem:[%s915_s3 + $0x38] sm:$0xff]   ;;  %v658_v22 = vld [vmem:[%s917_s5] sm:$0xff]   ;;  %597 = vmatprep.subr.bf16.mxu0 %v722_v23 }
  0x1b   :  { %564 = vmatpush3.bf16.msra.mxu1 %v645_v9  ;;  %v659_v24 = vld [vmem:[%s917_s5 + $0x8] sm:$0xff]   ;;  %v660_v25 = vld [vmem:[%s917_s5 + $0x10] sm:$0xff]   ;;  %v661_v26 = vld [vmem:[%s917_s5 + $0x18] sm:$0xff]  }
  0x1c   :  { %528 = vmatmul.mubr.msk.bf16.vlgmr.msra.gmra.mrb[0].mxu0 %vm85_vm0, %v48_v7  ;;  %565 = vmatprep.subr.bf16.mxu1 %v646_v10  ;;  %v662_v27 = vld [vmem:[%s917_s5 + $0x20] sm:$0xff]   ;;  %v663_v28 = vld [vmem:[%s917_s5 + $0x28] sm:$0xff]   ;;  %v664_v46 = vld [vmem:[%s917_s5 + $0x30] sm:$0xff]  }
  0x1d   :  { %598 = vmatpush3.bf16.msra.mxu0 %v658_v22  ;;  %v53_v32 = vld [vmem:[%s914_s2] sm:$0x3]  ;;  %v665_v47 = vld [vmem:[%s917_s5 + $0x38] sm:$0xff]   ;;  %613 = vmatprep.mubr.msk.bf16.mxu0 %vm723_vm1, %v722_v23  ;;  %v667_v49 = vld [vmem:[%s919_s7 + $0x8] sm:$0xff]  }
  0x1e   :  { %599 = vmatprep.subr.bf16.mxu0 %v722_v23  ;;  %v58_v34 = vrot.slane %v53_v32, %v57_v31  ;;  %v62_v35 = vrot.slane %v53_v32, %v61_v33  ;;  %v666_v48 = vld [vmem:[%s919_s7] sm:$0xff]   ;;  %v668_v59 = vld [vmem:[%s919_s7 + $0x10] sm:$0xff]   ;;  %v669_v60 = vld [vmem:[%s919_s7 + $0x18] sm:$0xff]   ;;  %s515_s7 = sshll.u32 %s724_s15, 4  ;;  %s516_s7 = int_to_ptr.vmem [resolvable:$true] %s515_s7 }
  0x1f   :  { %566 = vmatpush3.bf16.msra.mxu1 %v647_v11  ;;  %v529_v51 = vld [vmem:[%s916_s4] ss:$0 sm:$0xff]  ;;  %p697_p9 = scmp.lt.s32.totalorder %s516_s7, %s516_s7 }
  0x20   :  { %567 = vmatprep.subr.bf16.mxu1 %v648_v12  ;;  %v546_v61 = vld [vmem:[%s918_s6] ss:$0 sm:$0xff]  ;;  %s692_s6 = scalar_lea.vmem %s516_s7, 32 }
  0x21   :  { %600 = vmatpush3.bf16.msra.mxu0 %v659_v24  ;;  %v555_v5 = vld [vmem:[%s920_s8] ss:$0 sm:$0xff]  ;;  %p693_p8 = scmp.ne.s32.totalorder %s516_s7, %s692_s6  ;;  %p698_p10 = scmp.lt.s32.totalorder %s692_s6, %s692_s6 }
  0x22   :  { %601 = vmatprep.subr.bf16.mxu0 %v722_v23 }
  0x23   :  { %568 = vmatpush3.bf16.msra.mxu1 %v649_v13  ;;  %p699_p11 = por %p698_p10, %p697_p9 }
  0x24   :  { %569 = vmatprep.subr.bf16.mxu1 %v650_v14 }
  0x25   :  { %602 = vmatpush3.bf16.msra.mxu0 %v660_v25  ;;  %p700_p12 = pnand %p699_p11, %p693_p8 }
  0x26   :  { %603 = vmatprep.subr.bf16.mxu0 %v722_v23 }
  0x27   :  { %570 = vmatpush3.bf16.msra.mxu1 %v651_v15 }
  0x28   :  { %571 = vmatprep.subr.bf16.mxu1 %v652_v16 }
  0x29   :  { %604 = vmatpush3.bf16.msra.mxu0 %v661_v26 }
  0x2a   :  { %605 = vmatprep.subr.bf16.mxu0 %v722_v23 }
  0x2b   :  { %572 = vmatpush3.bf16.msra.mxu1 %v653_v17 }
  0x2c   :  { %573 = vmatprep.subr.bf16.mxu1 %v654_v18 }
  0x2d   :  { %606 = vmatpush3.bf16.msra.mxu0 %v662_v27 }
  0x2e   :  { %607 = vmatprep.subr.bf16.mxu0 %v722_v23 }
  0x2f   :  { %574 = vmatpush3.bf16.msra.mxu1 %v655_v19 }
  0x30   :  { %575 = vmatprep.subr.bf16.mxu1 %v656_v20 }
  0x31   :  { %608 = vmatpush3.bf16.msra.mxu0 %v663_v28 }
  0x32   :  { %609 = vmatprep.subr.bf16.mxu0 %v722_v23 }
  0x33   :  { %576 = vmatpush3.bf16.msra.mxu1 %v657_v21 }
  0x34   :  { %617 = vmatprep.subr.bf16.mxu1 %v722_v23 }
  0x35   :  { %610 = vmatpush3.bf16.msra.mxu0 %v664_v46 }
  0x36   :  { %611 = vmatprep.subr.bf16.mxu0 %v722_v23 }
  0x39   :  { %612 = vmatpush3.bf16.msra.mxu0 %v665_v47 }
  0xef   :  { %v123_v36 = vpop.f32.mrb[0].mxu0 }
  0xf0   :  { %v124_v37 = vadd.f32 %v123_v36, %v58_v34  ;;  %v125_v38 = vpop.f32.mrb[1].mxu0 }
  0xf1   :  { %v126_v39 = vadd.f32 %v125_v38, %v62_v35  ;;  %v127_v40 = vpop.f32.mrb[2].mxu0 }
  0xf2   :  { %v130_v41 = vmax.f32 %v124_v37, 0.0  ;;  %v128_v42 = vpop.f32.mrb[3].mxu0 }
  0xf3   :  { %v131_v43 = vmax.f32 %v126_v39, 0.0 }
  0xf4   :  { %v132_v45 = vpack.c.bf16 %v130_v41, %v130_v41 }
  0xf5   :  { %v133_v44 = vpack.c.bf16 %v131_v43, %v131_v43 }
  0xf7   :  { %301 = vmatprep.mubr.bf16.mxu1 %v133_v44 }
  0xf8   :  { %302 = vmatmul.mubr.bf16.vlgmr.msra.gmra.mrb[0].mxu1 %v132_v45 }
  0xf9   :  { %625 = vmatprep.mubr.msk.bf16.mxu1 %vm723_vm1, %v722_v23  ;;  %618 = vmatpush3.bf16.msra.mxu1 %v666_v48 }
  0xfa   :  { %619 = vmatprep.subr.bf16.mxu1 %v722_v23 }
  0xfd   :  { %620 = vmatpush3.bf16.msra.mxu1 %v667_v49 }
  0xfe   :  { %621 = vmatprep.subr.bf16.mxu1 %v722_v23 }
 0x101   :  { %622 = vmatpush3.bf16.msra.mxu1 %v668_v59 }
 0x102   :  { %623 = vmatprep.subr.bf16.mxu1 %v722_v23 }
 0x105   :  { %624 = vmatpush3.bf16.msra.mxu1 %v669_v60 }
 0x1cb   :  { %v577_v50 = vpop.f32.mrb[0].mxu1 }
 0x1cc   :  { %v578_v52 = vpop.f32.mrb[1].mxu1 }
 0x1cd   :  { %v579_v53 = vadd.f32 %v578_v52, %v577_v50  ;;  %v580_v54 = vpop.f32.mrb[2].mxu1 }
 0x1ce   :  { %v581_v55 = vpop.f32.mrb[3].mxu1 }
 0x1cf   :  { %v304_v56 = vadd.f32 %v579_v53, %v529_v51 }
 0x1d1   :  { %v309_v57 = vmax.f32 %v304_v56, 0.0 }
 0x1d3   :  { %v310_v58 = vpack.c.bf16 %v309_v57, %v309_v57 }
 0x1d5   :  { %614 = vmatmul.mubr.bf16.vlgmr.msra.gmra.mrb[4].mxu0 %v310_v58 }
 0x2a8   :  { %v416_v62 = vpop.f32.mrb[4].mxu0 }
 0x2a9   :  { %v417_v63 = vadd.f32 %v546_v61, %v416_v62  ;;  %v615_v0 = vpop.f32.mrb[5].mxu0 }
 0x2aa   :  { %v419_v1 = vpop.f32.mrb[6].mxu0 }
 0x2ab   :  { %v422_v2 = vmax.f32 %v417_v63, 0.0  ;;  %v616_v3 = vpop.f32.mrb[7].mxu0 }
 0x2ad   :  { %v423_v4 = vpack.c.bf16 %v422_v2, %v422_v2 }
 0x2af   :  { %626 = vmatmul.mubr.msk.bf16.vlgmr.msra.gmra.mrb[4].mxu1 %vm463_vm2, %v423_v4 }
 0x382   :  { %v501_v6 = vpop.f32.mrb[4].mxu1 }
 0x383   :  { %v502_v7 = vadd.f32 %v555_v5, %v501_v6  ;;  %v627_v8 = vpop.f32.mrb[5].mxu1 }
 0x384   :  { %v504_v9 = vpop.f32.mrb[6].mxu1 }
 0x385   :  { %v628_v10 = vpop.f32.mrb[7].mxu1  ;;  %508 = vst.msk [vmem:[#allocation5] sm:$0x3] %vm507_vm3, %v502_v7 }
 0x386   :  { %703 = shalt.err (!%p700_p12)
}
 0x387   :  { %s704_s8 = scalar_lea.hbm %s921_s9, 32 }
 0x388   :  { %p705_p13 = scmp.ne.s32.totalorder %s921_s9, %s704_s8  ;;  %p708_p0 = scmp.lt.u32.totalorder %s704_s8, %s921_s9 }
 0x38a   :  { %p710_p1 = pnand %p708_p0, %p705_p13 }
 0x38c   :  { %713 = shalt.err (!%p710_p1)
}
 0x38d   :  { %518 = dma.vmem_to_hbm [thread:$0]  %s516_s7, 32, %s921_s9, [#allocation4]  }
 0x38e   :  { %716 = dma.done.wait [#allocation4], 32  }
 0x38f   :  { %717 = vsyncadd [#allocation4], 4294967264 }
 0x390   :  { %522 = vsyncpa [#allocation3], 1 }
 0x391   :  { %523 = vsyncpa [#allocation4], 1 }

</bundles_post_ra>
